<compile_context>
chip_gen: v7x
topology: tpu7x:2x2x1
jax: 0.10.0
libtpu: 0.0.40
codegen_flags: <defaults>
</compile_context>

<pallas_src>
import jax
import jax.numpy as jnp
from jax.experimental import pallas as pl
from jax.experimental.pallas import tpu as pltpu

_MIB = 1024 * 1024


# ---------------------------------------------------------------------------
# Tile-size / VMEM-budget helpers
# ---------------------------------------------------------------------------

def _round_up(x, m):
    return ((x + m - 1) // m) * m


def _sublane_align(*dtypes):
    """Minimum sublane multiple for the given dtypes (8 f32 / 16 bf16 / 32 i8)."""
    a = 8
    for dt in dtypes:
        a = max(a, 32 // max(1, jnp.dtype(dt).itemsize))
    return a


def _vmem_budget():
    """(block_budget_bytes, vmem_limit_bytes), generation-aware and conservative.

    Physical VMEM: 128 MiB on v5e/v6e, 64 MiB per TensorCore on v7x; scoped
    defaults are only 16-32 MiB.  We request an explicit limit (safe on every
    generation) and keep the pipelined blocks well below it.
    """
    try:
        phys = int(pltpu.get_tpu_info().vmem_capacity_bytes)
    except Exception:
        phys = 0
    if not phys:
        phys = 64 * _MIB                       # assume the smallest (v7x per-TC)
    limit = min(40 * _MIB, (phys * 5) // 8)    # explicit scoped-VMEM request
    budget = (limit * 3) // 5                  # what the pipelined blocks may use
    return budget, limit


def _pick_tile_m(m_rows, per_row_bytes, fixed_bytes, budget_bytes, align):
    """Largest sublane-aligned row tile whose resident blocks fit the budget."""
    avail = max(budget_bytes - fixed_bytes, per_row_bytes * align)
    tm = max(align, (avail // per_row_bytes // align) * align)
    m_rounded = _round_up(m_rows, align)
    if m_rounded > 4 * align:                  # keep >= 2 grid steps for megacore
        tm = min(tm, max(align, _round_up((m_rounded + 1) // 2, align)))
    return min(tm, m_rounded)


def _pick_tile_lane(dim_padded, cap):
    """Largest multiple of 128 <= cap dividing dim_padded (dim_padded % 128 == 0)."""
    t = max(128, min(dim_padded, (cap // 128) * 128))
    while t > 128 and dim_padded % t:
        t -= 128
    return t


# ---------------------------------------------------------------------------
# O == 1 path: attention scorer.  VPU multiply + XLU lane-reduce, no MXU.
# ---------------------------------------------------------------------------

def _scorer_kernel(x_ref, w_ref, b_ref, o_ref):
    # x_ref: (tm, H) VMEM   w_ref: (1, H) f32 VMEM (resident, constant index map)
    # b_ref: (1,) SMEM scalar   o_ref: (tm, 1)
    xw = x_ref[...].astype(jnp.float32) * w_ref[...]
    s = jnp.sum(xw, axis=-1, keepdims=True)          # (tm, 1) f32
    o_ref[...] = (s + b_ref[0]).astype(o_ref.dtype)


def _pallas_scorer(x2d, weight, bias, out_dtype):
    m, h = x2d.shape
    budget, vmem_limit = _vmem_budget()
    align = _sublane_align(x2d.dtype, out_dtype)
    x_isz = jnp.dtype(x2d.dtype).itemsize
    o_isz = jnp.dtype(out_dtype).itemsize

    per_row = 2 * (h * x_isz + o_isz)        # double-buffered x + out rows
    fixed = 2 * h * 4                        # resident f32 weight row
    tm = _pick_tile_m(m, per_row, fixed, budget, align)
    m_pad = _round_up(m, tm)
    if m_pad != m:
        x2d = jnp.pad(x2d, ((0, m_pad - m), (0, 0)))

    w_row = weight.reshape(1, h).astype(jnp.float32)   # cast once, stays resident
    b_sc = bias.reshape(1).astype(jnp.float32)

    out = pl.pallas_call(
        _scorer_kernel,
        out_shape=jax.ShapeDtypeStruct((m_pad, 1), out_dtype),
        grid_spec=pltpu.PrefetchScalarGridSpec(
            num_scalar_prefetch=0,
            grid=(m_pad // tm,),
            in_specs=[
                pl.BlockSpec((tm, h), lambda i: (i, 0)),
                pl.BlockSpec((1, h), lambda i: (0, 0)),
                pl.BlockSpec(memory_space=pltpu.MemorySpace.SMEM),
            ],
            out_specs=pl.BlockSpec((tm, 1), lambda i: (i, 0)),
        ),
        compiler_params=pltpu.CompilerParams(
            dimension_semantics=("parallel",),
            vmem_limit_bytes=vmem_limit),
    )(x2d, w_row, b_sc)
    return out[:m]


# ---------------------------------------------------------------------------
# General O path: tiled MXU matmul, weight pre-transposed to (H, O).
# ---------------------------------------------------------------------------

def _matmul_single_k_kernel(x_ref, w_ref, b_ref, o_ref):
    # x_ref: (tm, tk)  w_ref: (tk, tn)  b_ref: (1, tn) f32  o_ref: (tm, tn)
    prod = jnp.dot(x_ref[...], w_ref[...], preferred_element_type=jnp.float32)
    o_ref[...] = (prod + b_ref[...]).astype(o_ref.dtype)


def _matmul_multi_k_kernel(x_ref, w_ref, b_ref, o_ref, acc_ref):
    k = pl.program_id(2)
    prod = jnp.dot(x_ref[...], w_ref[...], preferred_element_type=jnp.float32)

    @pl.when(k == 0)
    def _():
        acc_ref[...] = prod            # first K step writes directly (no memset)

    @pl.when(k > 0)
    def _():
        acc_ref[...] += prod

    @pl.when(k == pl.num_programs(2) - 1)
    def _():
        o_ref[...] = (acc_ref[...] + b_ref[...]).astype(o_ref.dtype)


def _pallas_linear(x2d, weight, bias, out_dtype):
    m, h = x2d.shape
    o = weight.shape[0]
    budget, vmem_limit = _vmem_budget()

    h_pad = _round_up(h, 128)
    o_pad = _round_up(o, 128)
    tk = _pick_tile_lane(h_pad, 512)
    tn = _pick_tile_lane(o_pad, 1024)    # large tn: x block is re-read per N tile
    kt = h_pad // tk
    multi_k = kt > 1

    x_isz = jnp.dtype(x2d.dtype).itemsize
    w_isz = jnp.dtype(weight.dtype).itemsize
    o_isz = jnp.dtype(out_dtype).itemsize
    align = _sublane_align(x2d.dtype, out_dtype)

    fixed = 2 * (tk * tn * w_isz + tn * 4)        # W + f32 bias (double-buffered)
    per_row = 2 * (tk * x_isz + tn * o_isz)       # x + out rows (double-buffered)
    if multi_k:
        per_row += tn * 4                         # f32 accumulator scratch
    tm = _pick_tile_m(m, per_row, fixed, budget, align)
    m_pad = _round_up(m, tm)

    if (m_pad, h_pad) != (m, h):
        x2d = jnp.pad(x2d, ((0, m_pad - m), (0, h_pad - h)))
    # One-time transpose of the small weight to (H, O): kernel does a plain
    # (tm,tk)x(tk,tn) contraction, no per-step tile transpose on the MXU path.
    w_t = jnp.pad(weight.T, ((0, h_pad - h), (0, o_pad - o))).astype(x2d.dtype)
    b2d = jnp.pad(bias.reshape(1, o).astype(jnp.float32),
                  ((0, 0), (0, o_pad - o)))

    if multi_k:
        kernel = _matmul_multi_k_kernel
        grid = (m_pad // tm, o_pad // tn, kt)
        in_specs = [
            pl.BlockSpec((tm, tk), lambda i, j, k: (i, k)),
            pl.BlockSpec((tk, tn), lambda i, j, k: (k, j)),
            pl.BlockSpec((1, tn), lambda i, j, k: (0, j)),
        ]
        out_specs = pl.BlockSpec((tm, tn), lambda i, j, k: (i, j))
        scratch = [pltpu.VMEM((tm, tn), jnp.float32)]
        dims = ("parallel", "parallel", "arbitrary")
    else:
        kernel = _matmul_single_k_kernel
        grid = (m_pad // tm, o_pad // tn)
        in_specs = [
            pl.BlockSpec((tm, tk), lambda i, j: (i, 0)),
            pl.BlockSpec((tk, tn), lambda i, j: (0, j)),
            pl.BlockSpec((1, tn), lambda i, j: (0, j)),
        ]
        out_specs = pl.BlockSpec((tm, tn), lambda i, j: (i, j))
        scratch = []
        dims = ("parallel", "parallel")

    out = pl.pallas_call(
        kernel,
        out_shape=jax.ShapeDtypeStruct((m_pad, o_pad), out_dtype),
        grid_spec=pltpu.PrefetchScalarGridSpec(
            num_scalar_prefetch=0,
            grid=grid,
            in_specs=in_specs,
            out_specs=out_specs,
            scratch_shapes=scratch,
        ),
        compiler_params=pltpu.CompilerParams(
            dimension_semantics=dims,
            vmem_limit_bytes=vmem_limit),
    )(x2d, w_t, b2d)
    return out[:m, :o]


# ---------------------------------------------------------------------------
# TimeDistributed(Linear) wrapper
# ---------------------------------------------------------------------------

def time_distributed_linear(x, weight, bias, *, compute_dtype=None):
    """TimeDistributed(nn.Linear)(x).

    x:      (batch, time, ..., hidden)   (>= 3 dims, like the PyTorch module)
    weight: (out_features, hidden)       PyTorch nn.Linear layout (no transpose)
    bias:   (out_features,)
    returns (batch, time, ..., out_features)

    Linear acts only on the last dim, so flattening all leading dims is
    equivalent to TimeDistributed's squash-first-two-dims + Linear.
    compute_dtype (e.g. jnp.bfloat16 on v6e/v7x) optionally casts x/W at the
    call boundary; accumulation stays f32 and the output keeps x.dtype.
    """
    if x.ndim <= 2:
        raise RuntimeError(f"No dimension to distribute: {x.shape}")
    out_dtype = x.dtype
    h = x.shape[-1]
    o = weight.shape[0]

    x2d = x.reshape(-1, h)
    if compute_dtype is not None:
        x2d = x2d.astype(compute_dtype)
        weight = weight.astype(compute_dtype)
    bias1d = bias.reshape(-1).astype(jnp.float32)

    if o == 1:
        out2d = _pallas_scorer(x2d, weight, bias1d, out_dtype)
    else:
        out2d = _pallas_linear(x2d, weight, bias1d, out_dtype)

    return out2d.reshape(x.shape[:-1] + (o,))


if __name__ == "__main__":
    key = jax.random.PRNGKey(0)
    kx, kw, kb, kw2, kb2, kw3, kb3 = jax.random.split(key, 7)

    # SelfAttentiveSpanExtractor scorer shape: batch=2, seq=8, hidden=32 -> 1
    B, T, H = 2, 8, 32
    x = jax.random.normal(kx, (B, T, H), dtype=jnp.float32)
    w1 = jax.random.normal(kw, (1, H), dtype=jnp.float32) * 0.1
    b1 = jax.random.normal(kb, (1,), dtype=jnp.float32) * 0.1

    out1 = jax.block_until_ready(time_distributed_linear(x, w1, b1))
    ref1 = jnp.einsum("bth,oh->bto", x, w1,
                      precision=jax.lax.Precision.HIGHEST) + b1
    assert out1.shape == (B, T, 1), out1.shape
    assert jnp.allclose(out1, ref1, atol=1e-4, rtol=1e-4), \
        float(jnp.max(jnp.abs(out1 - ref1)))

    # General TimeDistributed(Linear(H, O)) path (MXU, single-K tile).
    O = 128
    w2 = jax.random.normal(kw2, (O, H), dtype=jnp.float32) * 0.1
    b2 = jax.random.normal(kb2, (O,), dtype=jnp.float32) * 0.1
    out2 = jax.block_until_ready(time_distributed_linear(x, w2, b2))
    ref2 = jnp.einsum("bth,oh->bto", x, w2,
                      precision=jax.lax.Precision.HIGHEST) + b2
    assert out2.shape == (B, T, O), out2.shape
    assert jnp.allclose(out2, ref2, atol=1e-4, rtol=1e-4), \
        float(jnp.max(jnp.abs(out2 - ref2)))

    # Awkward out_features (exercises the O-padding / lane-dense output path).
    O3 = 20
    w3 = jax.random.normal(kw3, (O3, H), dtype=jnp.float32) * 0.1
    b3 = jax.random.normal(kb3, (O3,), dtype=jnp.float32) * 0.1
    out3 = jax.block_until_ready(time_distributed_linear(x, w3, b3))
    ref3 = jnp.einsum("bth,oh->bto", x, w3,
                      precision=jax.lax.Precision.HIGHEST) + b3
    assert out3.shape == (B, T, O3), out3.shape
    assert jnp.allclose(out3, ref3, atol=1e-4, rtol=1e-4), \
        float(jnp.max(jnp.abs(out3 - ref3)))

    print("KERNEL_OK")
</pallas_src>

<mosaic_0001>
module attributes {stable_mosaic.version = 11 : i64} {
  func.func @_scorer_kernel(%arg0: i32, %arg1: memref<16x32xf32, #tpu.memory_space<vmem>>, %arg2: memref<1x32xf32, #tpu.memory_space<vmem>>, %arg3: memref<1xf32, #tpu.memory_space<smem>>, %arg4: memref<16x1xf32, #tpu.memory_space<vmem>>) attributes {dimension_semantics = [#tpu.dimension_semantics<parallel>], iteration_bounds = array<i64: 1>, scalar_prefetch = 0 : i64, scratch_operands = 0 : i64, tpu.core_type = #tpu.core_type<tc>, window_params = [{transform_indices = @transform_0, window_bounds = array<i64: 16, 32>}, {pipeline_mode = #tpu.pipeline_mode<synchronous>, transform_indices = @transform_1, window_bounds = array<i64: 1, 32>}, {transform_indices = @transform_2, window_bounds = array<i64: 1>}, {transform_indices = @transform_3, window_bounds = array<i64: 16, 1>}]} {
    %c0 = arith.constant 0 : index
    %c0_0 = arith.constant 0 : index
    %0 = vector.load %arg1[%c0, %c0_0] : memref<16x32xf32, #tpu.memory_space<vmem>>, vector<16x32xf32>
    %c0_1 = arith.constant 0 : index
    %c0_2 = arith.constant 0 : index
    %1 = vector.load %arg2[%c0_1, %c0_2] : memref<1x32xf32, #tpu.memory_space<vmem>>, vector<1x32xf32>
    %2 = vector.broadcast %1 : vector<1x32xf32> to vector<16x32xf32>
    %3 = arith.mulf %0, %2 : vector<16x32xf32>
    %cst = arith.constant dense<0.000000e+00> : vector<16xf32>
    %4 = vector.multi_reduction <add>, %3, %cst [1] : vector<16x32xf32> to vector<16xf32>
    %5 = vector.shape_cast %4 : vector<16xf32> to vector<16x1xf32>
    %c0_3 = arith.constant 0 : index
    %6 = memref.load %arg3[%c0_3] : memref<1xf32, #tpu.memory_space<smem>>
    %7 = vector.broadcast %6 : f32 to vector<16x1xf32>
    %8 = arith.addf %5, %7 : vector<16x1xf32>
    %c0_4 = arith.constant 0 : index
    %c0_5 = arith.constant 0 : index
    %9 = vector.load %arg4[%c0_4, %c0_5] : memref<16x1xf32, #tpu.memory_space<vmem>>, vector<16x1xf32>
    tpu.vector_store %arg4[%c0_4, %c0_5], %8 {strides = array<i32>} : memref<16x1xf32, #tpu.memory_space<vmem>>, vector<16x1xf32>,
    return
  }
  func.func @transform_0(%arg0: i32) -> (i32, i32) {
    %c0_i32 = arith.constant 0 : i32
    %c0_i32_0 = arith.constant 0 : i32
    return %arg0, %c0_i32 : i32, i32
  }
  func.func @transform_1(%arg0: i32) -> (i32, i32) {
    %c0_i32 = arith.constant 0 : i32
    %c0_i32_0 = arith.constant 0 : i32
    %c0_i32_1 = arith.constant 0 : i32
    return %c0_i32, %c0_i32_0 : i32, i32
  }
  func.func @transform_2(%arg0: i32) -> i32 {
    %c0_i32 = arith.constant 0 : i32
    %c0_i32_0 = arith.constant 0 : i32
    return %c0_i32 : i32
  }
  func.func @transform_3(%arg0: i32) -> (i32, i32) {
    %c0_i32 = arith.constant 0 : i32
    %c0_i32_0 = arith.constant 0 : i32
    return %arg0, %c0_i32 : i32, i32
  }
}

</mosaic_0001>

<bundles_post_ra>
// kernel: tpu_custom_call.1
= control target key start
LH: loop header
LB: loop body
LE: loop exit
PB: predicated region body
PF: predicated region fallthrough
CT: control target
= control target key end

     0   :  { %9 = vsyncpa [#allocation4], 0  ;;  %s87_s12 = smov [#allocation3]   ;;  %s134_s0 = inlined_call_operand.hbm [shape: f32[16,32], index: 0, kind: input, shape index: {}]   ;;  %s135_s1 = inlined_call_operand.vmem [shape: f32[1,32], index: 1, kind: input, shape index: {}]   ;;  %s136_s2 = inlined_call_operand.<no memory space> [shape: f32[1], index: 2, kind: input, shape index: {}]   ;;  %s137_s3 = inlined_call_operand.vmem [shape: f32[16,1], index: 3, kind: output, shape index: {}]  }
   0x1   :  { %s15_s13 = sshll.u32 %s87_s12, 4  ;;  %s63_s16 = scalar_lea.hbm %s134_s0, 256  ;;  %s16_s13 = int_to_ptr.vmem [resolvable:$true] %s15_s13 }
   0x2   :  { %p64_p0 = scmp.ne.s32.totalorder %s134_s0, %s63_s16  ;;  %p67_p1 = scmp.lt.u32.totalorder %s63_s16, %s134_s0 }
   0x4   :  { %p69_p2 = pnand %p67_p1, %p64_p0 }
   0x6   :  { %72 = shalt.err (!%p69_p2)
}
   0x7   :  { %s73_s21 = scalar_lea.vmem %s16_s13, 256  ;;  %p78_p4 = scmp.lt.s32.totalorder %s16_s13, %s16_s13 }
   0x8   :  { %p74_p3 = scmp.ne.s32.totalorder %s16_s13, %s73_s21  ;;  %p79_p5 = scmp.lt.s32.totalorder %s73_s21, %s73_s21 }
   0xa   :  { %p80_p6 = por %p79_p5, %p78_p4 }
   0xc   :  { %p81_p7 = pnand %p80_p6, %p74_p3 }
   0xe   :  { %84 = shalt.err (!%p81_p7)
}
   0xf   :  { %s88_s22 = smov 128   ;;  %s89_s23 = smov 8  }
  0x10   :  { %21 = dma.hbm_to_vmem [thread:$0]  %s134_s0, 256, %s16_s13, [#allocation4], %s88_s22, %s88_s22, %s89_s23  }
  0x11   :  { %85 = dma.done.wait [#allocation4], 256  }
  0x12   :  { %86 = vsyncadd [#allocation4], 4294967040  ;;  %v29_v0 = vld [vmem:[#allocation3] sm:$0xff]  ;;  %vm40_vm0 = vcmask 261120   ;;  %v30_v2 = vld [vmem:[#allocation3 + $0x8] sm:$0xff]  ;;  %v48_v7 = vstv %s136_s2  ;;  %vm51_vm1 = vcmask 7168  }
  0x13   :  { %v59_v1 = vld [vmem:[%s135_s1] ss:$0 sm:$0xff] }
  0x14   :  { %v38_v3 = vmul.f32 %v59_v1, %v29_v0  ;;  %v39_v4 = vmul.f32 %v59_v1, %v30_v2 }
  0x16   :  { %v41_v5 = vsel %vm40_vm0, %v38_v3, 0.0  ;;  %v44_v6 = vsel %vm40_vm0, %v39_v4, 0.0 }
  0x17   :  { %42 = vadd.xlane.f32.xlu0 %v41_v5 }
  0x1b   :  { %45 = vadd.xlane.f32.xlu0 %v44_v6 }
  0xa4   :  { %v43_v8 = vpop.xlane.xlu0 %42 }
  0xa5   :  { %v49_v9 = vadd.f32 %v48_v7, %v43_v8 }
  0xa7   :  { %52 = vst.msk [vmem:[%s137_s3] sm:$0xff] %vm51_vm1, %v49_v9 }
  0xa8   :  { %v46_v10 = vpop.xlane.xlu0 %45 }
  0xa9   :  { %v50_v11 = vadd.f32 %v48_v7, %v46_v10 }
  0xab   :  { %53 = vst.msk [vmem:[%s137_s3 + $0x8] sm:$0xff] %vm51_vm1, %v50_v11 }
  0xac   :  { %58 = vsyncpa [#allocation4], 1 }

</bundles_post_ra>
